<compile_context>
chip_gen: v7x
topology: tpu7x:2x2x1
jax: 0.10.0
libtpu: 0.0.40
codegen_flags: <defaults>
</compile_context>

<pallas_src>
import functools

import jax
import jax.numpy as jnp
from jax.experimental import pallas as pl
from jax.experimental.pallas import tpu as pltpu


def _trap_kernel(x_ref, p_ref, o_ref, *, tanh_dtype):
    # x_ref: (TB, TR, L) block of batch elements
    # p_ref: (4, TR, L) packed params [s1, t1, s2, t2] (broadcast over batch)
    x = x_ref[...]
    s1 = p_ref[0]
    t1 = p_ref[1]
    s2 = p_ref[2]
    t2 = p_ref[3]

    # Core(z) with z=(x-A)/(B-A) folded: tanh(2z-1) == tanh(x*s1 + t1)
    a = x * s1 + t1
    b = x * s2 + t2
    if tanh_dtype != jnp.float32:
        a = a.astype(tanh_dtype)
        b = b.astype(tanh_dtype)
    ta = jnp.tanh(a).astype(jnp.float32)
    tb = jnp.tanh(b).astype(jnp.float32)
    # (ta+1)/2 * (tb+1)/2 == 0.25*(ta+1)*(tb+1)
    o_ref[...] = (0.25 * (ta + 1.0) * (tb + 1.0)).astype(o_ref.dtype)


def _prefer_bf16_tanh():
    """bf16 tanh only pays off on v7x (f32 EUP ~at the HBM roofline there)."""
    try:
        kind = jax.devices()[0].device_kind.lower()
    except Exception:
        return False
    return "v7" in kind


def trap_function(x, A, B, C, D, *, tanh_in_bf16=False,
                  max_block_batch=256, block_bytes_target=2 << 20):
    """x: [N, C, H, W] float32; A,B,C,D: [C, H, W] float32 -> [N, C, H, W]."""
    N = int(x.shape[0])
    per_ex = int(x[0].size)  # C*H*W
    itemsize = 4             # f32 x / out

    # Layout: prefer lane-dense (rows, 128); if C*H*W isn't a multiple of 128
    # fall back to a full-extent lane dim (block last dims equal array dims).
    if per_ex % 128 == 0:
        lanes = 128
    else:
        lanes = per_ex
    rows = per_ex // lanes
    plane_bytes = rows * lanes * itemsize  # one example, f32

    # Fold the batch-invariant affine normalization into scale/offset once:
    #   tanh(2*(x-A)/(B-A) - 1) = tanh(x*s1 + t1),  s1 = 2/(B-A), t1 = -2A/(B-A) - 1
    #   tanh(2*(x-D)/(C-D) - 1) = tanh(x*s2 + t2),  s2 = 2/(C-D), t2 = -2D/(C-D) - 1
    inv_ba = 1.0 / (B - A)
    inv_cd = 1.0 / (C - D)
    s1 = 2.0 * inv_ba
    t1 = -2.0 * A * inv_ba - 1.0
    s2 = 2.0 * inv_cd
    t2 = -2.0 * D * inv_cd - 1.0
    params = jnp.stack([s1, t1, s2, t2], axis=0).reshape(4, rows, lanes)

    # ---- Tile sizing (VMEM-aware, no host-side padding) ----
    if plane_bytes <= block_bytes_target:
        TR = rows
        TB = max(1, min(N, max_block_batch, block_bytes_target // plane_bytes))
    else:
        # One example's plane is itself multi-MiB: tile the rows axis instead.
        TB = 1
        if rows > 8 and lanes == 128:
            TR = max(8, min(rows, (block_bytes_target // (lanes * itemsize)) // 8 * 8))
        else:
            TR = rows  # cannot tile further; covered by the raised VMEM limit

    # Guarantee >= 2 batch blocks when N > 1 (v7x second core + pipeline
    # overlap), then rebalance TB so the ragged tail is minimal.
    nb_batch = pl.cdiv(N, TB)
    if N > 1 and nb_batch < 2:
        nb_batch = 2
    TB = pl.cdiv(N, nb_batch)
    nb_batch = pl.cdiv(N, TB)
    nb_rows = pl.cdiv(rows, TR)

    x_block_bytes = TB * TR * lanes * itemsize
    p_block_bytes = 4 * TR * lanes * itemsize
    # 2x in + 2x out + 2x params (double-buffered) + slack.
    vmem_need = 2 * x_block_bytes + 2 * x_block_bytes + 2 * p_block_bytes + (1 << 20)
    vmem_limit = int(min(48 << 20, max(32 << 20, int(1.5 * vmem_need))))

    x2 = x.reshape(N, rows, lanes)
    tanh_dtype = jnp.bfloat16 if tanh_in_bf16 else jnp.float32

    cost = pl.CostEstimate(
        flops=8 * N * per_ex,
        transcendentals=2 * N * per_ex,
        bytes_accessed=2 * N * per_ex * itemsize + 4 * per_ex * itemsize,
    )

    out = pl.pallas_call(
        functools.partial(_trap_kernel, tanh_dtype=tanh_dtype),
        out_shape=jax.ShapeDtypeStruct((N, rows, lanes), x.dtype),
        grid_spec=pltpu.PrefetchScalarGridSpec(
            num_scalar_prefetch=0,
            grid=(nb_batch, nb_rows),
            in_specs=[
                pl.BlockSpec((TB, TR, lanes), lambda i, j: (i, j, 0)),
                pl.BlockSpec((4, TR, lanes), lambda i, j: (0, j, 0)),
            ],
            out_specs=pl.BlockSpec((TB, TR, lanes), lambda i, j: (i, j, 0)),
        ),
        compiler_params=pltpu.CompilerParams(
            dimension_semantics=("parallel", "parallel"),
            vmem_limit_bytes=vmem_limit,
        ),
        cost_estimate=cost,
    )(x2, params)

    return out.reshape(x.shape)


if __name__ == "__main__":
    key = jax.random.PRNGKey(0)
    k_x, k_p = jax.random.split(key)

    N, C, H, W = 2, 4, 16, 16
    input_shape = (C, H, W)

    # Deterministic parameter init, mirroring:
    #   trap_abcd, _ = torch.sort(torch.rand([4, *input_shape]), dim=0)
    raw = jax.random.uniform(k_p, (4, *input_shape), dtype=jnp.float32)
    trap_abcd = jnp.sort(raw, axis=0)
    A, B, Cc, D = trap_abcd[0], trap_abcd[1], trap_abcd[2], trap_abcd[3]

    x = jax.random.uniform(k_x, (N, C, H, W), dtype=jnp.float32)

    use_bf16_tanh = _prefer_bf16_tanh()
    out = trap_function(x, A, B, Cc, D, tanh_in_bf16=use_bf16_tanh)
    out = jax.block_until_ready(out)

    # Pure-JAX reference (original, un-folded form).
    core = lambda z: (jnp.tanh(z * 2.0 - 1.0) + 1.0) / 2.0
    m_ref = core((x - A) / (B - A))
    n_ref = core((x - D) / (Cc - D))
    ref = m_ref * n_ref

    tol = 2e-3 if use_bf16_tanh else 1e-5
    assert out.shape == (N, C, H, W)
    assert jnp.allclose(out, ref, atol=tol, rtol=tol)

    print("KERNEL_OK")
</pallas_src>

<mosaic_0001>
module attributes {stable_mosaic.version = 11 : i64} {
  func.func @_trap_kernel(%arg0: i32, %arg1: i32, %arg2: memref<1x8x128xf32, #tpu.memory_space<vmem>>, %arg3: memref<4x8x128xf32, #tpu.memory_space<vmem>>, %arg4: memref<1x8x128xf32, #tpu.memory_space<vmem>>) attributes {dimension_semantics = [#tpu.dimension_semantics<parallel>, #tpu.dimension_semantics<parallel>], iteration_bounds = array<i64: 2, 1>, scalar_prefetch = 0 : i64, scratch_operands = 0 : i64, tpu.core_type = #tpu.core_type<tc>, window_params = [{transform_indices = @transform_0, window_bounds = array<i64: 1, 8, 128>}, {transform_indices = @transform_1, window_bounds = array<i64: 4, 8, 128>}, {transform_indices = @transform_2, window_bounds = array<i64: 1, 8, 128>}]} {
    %c0 = arith.constant 0 : index
    %c0_0 = arith.constant 0 : index
    %c0_1 = arith.constant 0 : index
    %0 = vector.load %arg2[%c0, %c0_0, %c0_1] : memref<1x8x128xf32, #tpu.memory_space<vmem>>, vector<1x8x128xf32>
    %c0_2 = arith.constant 0 : index
    %c0_3 = arith.constant 0 : index
    %c0_4 = arith.constant 0 : index
    %1 = vector.load %arg3[%c0_2, %c0_3, %c0_4] : memref<4x8x128xf32, #tpu.memory_space<vmem>>, vector<1x8x128xf32>
    %2 = vector.shape_cast %1 : vector<1x8x128xf32> to vector<8x128xf32>
    %c1 = arith.constant 1 : index
    %c0_5 = arith.constant 0 : index
    %c0_6 = arith.constant 0 : index
    %3 = vector.load %arg3[%c1, %c0_5, %c0_6] : memref<4x8x128xf32, #tpu.memory_space<vmem>>, vector<1x8x128xf32>
    %4 = vector.shape_cast %3 : vector<1x8x128xf32> to vector<8x128xf32>
    %c2 = arith.constant 2 : index
    %c0_7 = arith.constant 0 : index
    %c0_8 = arith.constant 0 : index
    %5 = vector.load %arg3[%c2, %c0_7, %c0_8] : memref<4x8x128xf32, #tpu.memory_space<vmem>>, vector<1x8x128xf32>
    %6 = vector.shape_cast %5 : vector<1x8x128xf32> to vector<8x128xf32>
    %c3 = arith.constant 3 : index
    %c0_9 = arith.constant 0 : index
    %c0_10 = arith.constant 0 : index
    %7 = vector.load %arg3[%c3, %c0_9, %c0_10] : memref<4x8x128xf32, #tpu.memory_space<vmem>>, vector<1x8x128xf32>
    %8 = vector.shape_cast %7 : vector<1x8x128xf32> to vector<8x128xf32>
    %9 = vector.shape_cast %2 : vector<8x128xf32> to vector<1x8x128xf32>
    %10 = arith.mulf %0, %9 : vector<1x8x128xf32>
    %11 = vector.shape_cast %4 : vector<8x128xf32> to vector<1x8x128xf32>
    %12 = arith.addf %10, %11 : vector<1x8x128xf32>
    %13 = vector.shape_cast %6 : vector<8x128xf32> to vector<1x8x128xf32>
    %14 = arith.mulf %0, %13 : vector<1x8x128xf32>
    %15 = vector.shape_cast %8 : vector<8x128xf32> to vector<1x8x128xf32>
    %16 = arith.addf %14, %15 : vector<1x8x128xf32>
    %17 = math.tanh %12 : vector<1x8x128xf32>
    %18 = math.tanh %16 : vector<1x8x128xf32>
    %cst = arith.constant 1.000000e+00 : f32
    %19 = vector.broadcast %cst : f32 to vector<1x8x128xf32>
    %20 = arith.addf %17, %19 : vector<1x8x128xf32>
    %cst_11 = arith.constant 2.500000e-01 : f32
    %21 = vector.broadcast %cst_11 : f32 to vector<1x8x128xf32>
    %22 = arith.mulf %21, %20 : vector<1x8x128xf32>
    %cst_12 = arith.constant 1.000000e+00 : f32
    %23 = vector.broadcast %cst_12 : f32 to vector<1x8x128xf32>
    %24 = arith.addf %18, %23 : vector<1x8x128xf32>
    %25 = arith.mulf %22, %24 : vector<1x8x128xf32>
    %c0_13 = arith.constant 0 : index
    %c0_14 = arith.constant 0 : index
    %c0_15 = arith.constant 0 : index
    %26 = vector.load %arg4[%c0_13, %c0_14, %c0_15] : memref<1x8x128xf32, #tpu.memory_space<vmem>>, vector<1x8x128xf32>
    tpu.vector_store %arg4[%c0_13, %c0_14, %c0_15], %25 {strides = array<i32>} : memref<1x8x128xf32, #tpu.memory_space<vmem>>, vector<1x8x128xf32>,
    return
  }
  func.func @transform_0(%arg0: i32, %arg1: i32) -> (i32, i32, i32) {
    %c0_i32 = arith.constant 0 : i32
    %c0_i32_0 = arith.constant 0 : i32
    return %arg0, %arg1, %c0_i32 : i32, i32, i32
  }
  func.func @transform_1(%arg0: i32, %arg1: i32) -> (i32, i32, i32) {
    %c0_i32 = arith.constant 0 : i32
    %c0_i32_0 = arith.constant 0 : i32
    %c0_i32_1 = arith.constant 0 : i32
    return %c0_i32, %arg1, %c0_i32_0 : i32, i32, i32
  }
  func.func @transform_2(%arg0: i32, %arg1: i32) -> (i32, i32, i32) {
    %c0_i32 = arith.constant 0 : i32
    %c0_i32_0 = arith.constant 0 : i32
    return %arg0, %arg1, %c0_i32 : i32, i32, i32
  }
}

</mosaic_0001>

<bundles_post_ra>
// kernel: tpu_custom_call.1
= control target key start
LH: loop header
LB: loop body
LE: loop exit
PB: predicated region body
PF: predicated region fallthrough
CT: control target
= control target key end

     0   :  { %7 = vsyncpa [#allocation3], 0  ;;  %s798_s0 = inlined_call_operand.hbm [shape: f32[2,8,128], index: 0, kind: input, shape index: {}]   ;;  %s799_s1 = inlined_call_operand.hbm [shape: f32[4,8,128], index: 1, kind: input, shape index: {}]   ;;  %s800_s2 = inlined_call_operand.hbm [shape: f32[2,8,128], index: 2, kind: output, shape index: {}]  }
   0x1   :  { %9 = vsyncpa [#allocation3 + $0x1], 0 }
   0x2   :  { %10 = vsyncpa [#allocation6], 0 }
   0x3   :  { %11 = vsyncpa [#allocation4], 0 }
   0x4   :  { %13 = vsyncpa [#allocation4 + $0x1], 0  ;;  %s584_s9 = smov 0   ;;  %s586_s10 = smov 0  }
   0x5   :  { %s588_s11 = smov 0   ;;  %s590_s12 = smov 0  }
   0x6   :  { %s592_s13 = smov 0   ;;  %s594_s14 = smov 0  }
   0x7 LB: > { %s324_s15 = sadd.s32 4294967295, %s562_s14   ;;  %s325_s16 = sadd.s32 4294967294, %s562_s14   ;;  %s562_s14 = sphi %s594_s14, %s19_s14   ;;  %s558_s13 = sphi %s592_s13, %s824_s13   ;;  %s554_s12 = sphi %s590_s12, %s823_s12   ;;  %s550_s11 = sphi %s588_s11, %s822_s11   ;;  %s546_s10 = sphi %s586_s10, %s821_s10   ;;  %s542_s9 = sphi %s584_s9, %s820_s9  }
   0x8   : > { %p53_p0 = scmp.ne.s32.totalorder %s546_s10, %s542_s9  ;;  %p618_p1 = scmp.eq.s32.totalorder %s324_s15, 0 }
   0x9   : > { %p622_p2 = scmp.eq.s32.totalorder %s324_s15, 1  ;;  %p111_p3 = scmp.eq.s32.totalorder %s325_s16, 1 }
   0xa   : > { %s805_s17 = scalar_select %p618_p1, 1, 0 }
   0xb   : > { %s806_s18 = scalar_select %p622_p2, 1, 0 }
   0xc   : > { %p628_p4 = por %p618_p1, %p53_p0  ;;  %p326_p5 = scmp.ge.s32.totalorder %s562_s14, 1 }
   0xd   : > { %p633_p6 = por %p111_p3, %p53_p0  ;;  %p118_p7 = scmp.lt.s32.totalorder %s562_s14, 3 }
   0xe   : > { %s807_s19 = scalar_select %p628_p4, 1, 0 }
   0xf   : > { %s808_s20 = scalar_select %p633_p6, 1, 0 }
  0x10   : > { %p638_p8 = pnand %p326_p5, %p118_p7  ;;  %s564_s22 = smov [#allocation5]  }
  0x11   : > { %s132_s23 = sshll.u32 %s564_s22, 4  ;;  %s31_s25 = sadd.s32 1, %s558_s13  ;;  %s133_s23 = int_to_ptr.vmem [resolvable:$true] %s132_s23 }
  0x12   : > { %s809_s21 = scalar_select %p638_p8, 1, 0 }
  0x13   : > { %p347_p9 = pneg %p638_p8  ;;  %s418_s28 = scalar_lea.hbm %s799_s1, 512 }
  0x14   : > { %p419_p12 = scmp.ne.s32.totalorder %s799_s1, %s418_s28  ;;  %p425_p5 = scmp.lt.u32.totalorder %s418_s28, %s799_s1 }
  0x15   : > { %p647_p11 = pnand %p347_p9, %p618_p1 }
  0x17   : > { %p420_p13 = pneg %p647_p11 }
  0x19   : > { %p421_p0 = pnand %p420_p13, %p419_p12 }
  0x1b   : > { %p422_p3 = pneg %p421_p0 }
  0x1d   : > { %p427_p7 = pnand %p425_p5, %p422_p3 }
  0x1f   : > { %430 = shalt.err (!%p427_p7)
}
  0x20   : > { %s431_s5 = scalar_lea.vmem %s133_s23, 512  ;;  %p439_p1 = scmp.lt.s32.totalorder %s133_s23, %s133_s23 }
  0x21   : > { %p432_p9 = scmp.ne.s32.totalorder %s133_s23, %s431_s5  ;;  %p440_p4 = scmp.lt.s32.totalorder %s431_s5, %s431_s5 }
  0x23   : > { %p434_p10 = pnand %p432_p9, %p420_p13  ;;  %p441_p8 = por %p440_p4, %p439_p1 }
  0x25   : > { %p435_p6 = pneg %p434_p10 }
  0x27   : > { %p442_p2 = pnand %p441_p8, %p435_p6 }
  0x29   : > { %445 = shalt.err (!%p442_p2)
}
  0x2a   : > { %s565_s6 = smov 128   ;;  %s566_s7 = smov 8  }
  0x2b   : > { %350 = dma.hbm_to_vmem [thread:$0]  (!%p647_p11), %s799_s1, 512, %s133_s23, [#allocation6], %s565_s6, %s565_s6, %s566_s7  }
  0x2c   : > { %p33_p1 = scmp.ge.s32.totalorder %s31_s25, 2  ;;  %s40_s16 = sadd.s32 1, %s550_s11 }
  0x2d   : > { %p47_p2 = scmp.ne.s32.totalorder %s550_s11, %s546_s10  ;;  %p48_p4 = scmp.eq.s32.totalorder %s562_s14, 0 }
  0x2e   : > { %s826_s25 = smov (%p33_p1, %s31_s25), 0  ;;  %p812_p8 = scmp.ne.s32.totalorder %s806_s18, 0 }
  0x2f   : > { %p674_p6 = por %p48_p4, %p47_p2  ;;  %s35_s24 = ssub.s32 %s558_s13, %s826_s25 }
  0x30   : > { %p680_p10 = por %p812_p8, %p47_p2  ;;  %p360_p12 = scmp.lt.s32.totalorder %s562_s14, 2 }
  0x31   : > { %p38_p11 = scmp.eq.s32.totalorder %s35_s24, 0  ;;  %s146_s23 = sand.u32 1, %s550_s11  }
  0x32   : > { %s329_s27 = sshll.u32 %s146_s23, 3  ;;  %s330_s29 = sshll.u32 %s558_s13, 7 }
  0x33   : > { %s689_s28 = scalar_select %p38_p11, %s550_s11, %s40_s16  }
  0x34   : > { %s695_s4 = scalar_lea.hbm %s798_s0, %s330_s29  ;;  %s150_s18 = scalar_lea.vmem [#allocation2], %s329_s27 }
  0x35   : > { %s158_s5 = sshll.u32 %s150_s18, 4  ;;  %p701_p13 = pnand %p360_p12, %p674_p6  ;;  %s697_s5 = int_to_ptr.vmem [resolvable:$true] %s158_s5 }
  0x36   : > { %s147_s7 = scalar_lea.sflag [#allocation3], %s146_s23  ;;  %s446_s8 = scalar_lea.hbm %s695_s4, 128 }
  0x37   : > { %p447_p0 = scmp.ne.s32.totalorder %s695_s4, %s446_s8  ;;  %p448_p3 = pneg %p701_p13 }
  0x38   : > { %s451_s24 = scalar_lea.hbm %s798_s0, 256  ;;  %p452_p9 = scmp.lt.u32.totalorder %s695_s4, %s798_s0 }
  0x39   : > { %p449_p5 = pnand %p448_p3, %p447_p0  ;;  %p453_p1 = scmp.lt.u32.totalorder %s451_s24, %s446_s8 }
  0x3a   : > { %p455_p4 = scmp.lt.u32.totalorder %s446_s8, %s695_s4 }
  0x3b   : > { %p450_p7 = pneg %p449_p5  ;;  %p454_p2 = por %p453_p1, %p452_p9 }
  0x3d   : > { %p456_p6 = por %p455_p4, %p454_p2 }
  0x3f   : > { %p457_p8 = pnand %p456_p6, %p450_p7 }
  0x41   : > { %460 = shalt.err (!%p457_p8)
}
  0x42   : > { %s461_s23 = scalar_lea.vmem %s697_s5, 128  ;;  %s567_s29 = smov [#allocation2]  }
  0x43   : > { %p462_p12 = scmp.ne.s32.totalorder %s697_s5, %s461_s23  ;;  %s466_s30 = sshll.u32 %s567_s29, 4  ;;  %s467_s30 = int_to_ptr.vmem [resolvable:$false] %s466_s30 }
  0x44   : > { %s468_s3 = scalar_lea.vmem %s467_s30, 256  ;;  %p469_p5 = scmp.lt.s32.totalorder %s697_s5, %s467_s30 }
  0x45   : > { %p464_p11 = pnand %p462_p12, %p448_p3  ;;  %p470_p9 = scmp.lt.s32.totalorder %s468_s3, %s461_s23 }
  0x47   : > { %p465_p0 = pneg %p464_p11  ;;  %p471_p1 = por %p470_p9, %p469_p5 }
  0x49   : > { %p472_p2 = pnand %p471_p1, %p465_p0 }
  0x4b   : > { %475 = shalt.err (!%p472_p2)
}
  0x4c   : > { %354 = dma.hbm_to_vmem [thread:$0]  (!%p701_p13), %s695_s4, 128, %s697_s5, %s147_s7  }
  0x4d   : > { %p815_p7 = scmp.ne.s32.totalorder %s809_s21, 0 }
  0x4e   : > { %s733_s18 = sand.u32 (!%p815_p7), 1, %s546_s10   ;;  %p816_p3 = scmp.ne.s32.totalorder (!%p815_p7), %s807_s19, 0 }
  0x4f   : > { %167 = sbr.rel (%p815_p7) target bundleno = 126 (0x7e), region = 28  ;;  %s332_s8 = sshll.u32 (!%p815_p7), %s733_s18, 3 }
  0x50   : > { %s170_s15 = scalar_lea.sflag (!%p815_p7), [#allocation3], %s733_s18  ;;  %s173_s16 = scalar_lea.vmem (!%p815_p7), [#allocation2], %s332_s8 }
  0x56   : > { %529 = dma.done.wait (%p816_p3), %s170_s15, 128  }
  0x57   : > { %531 = vsyncadd (%p816_p3), %s170_s15, 4294967168  ;;  %p817_p4 = scmp.ne.s32.totalorder %s805_s17, 0 }
  0x59   : > { %533 = dma.done.wait (%p817_p4), [#allocation6], 512  }
  0x5a   : > { %535 = vsyncadd (%p817_p4), [#allocation6], 4294966784  ;;  %v198_v0 = vld [vmem:[%s173_s16] sm:$0xff]  ;;  %v199_v1 = vld [vmem:[#allocation5] sm:$0xff]  ;;  %s197_s17 = scalar_lea.vmem [#allocation7], %s332_s8  ;;  %s336_s21 = sshll.u32 %s554_s12, 7 }
  0x5b   : > { %v201_v2 = vld [vmem:[#allocation5 + $0x8] sm:$0xff]  ;;  %v203_v3 = vld [vmem:[#allocation5 + $0x10] sm:$0xff]  ;;  %v205_v4 = vld [vmem:[#allocation5 + $0x18] sm:$0xff]  ;;  %v206_v5 = vmul.f32 %v199_v1, %v198_v0  ;;  %s232_s19 = sshll.u32 %s197_s17, 4  ;;  %s751_s6 = scalar_lea.hbm %s800_s2, %s336_s21  ;;  %s746_s19 = int_to_ptr.vmem [resolvable:$true] %s232_s19 }
  0x5c   : > { %v208_v6 = vmul.f32 %v203_v3, %v198_v0  ;;  %s218_s7 = scalar_lea.sflag [#allocation4], %s733_s18  ;;  %s476_s24 = scalar_lea.vmem %s746_s19, 128 }
  0x5d   : > { %v207_v7 = vadd.f32 %v206_v5, %v201_v2  ;;  %p477_p13 = scmp.ne.s32.totalorder %s746_s19, %s476_s24  ;;  %s568_s12 = smov [#allocation7]  }
  0x5e   : > { %v209_v8 = vadd.f32 %v208_v6, %v205_v4  ;;  %s480_s22 = sshll.u32 %s568_s12, 4  ;;  %s481_s22 = int_to_ptr.vmem [resolvable:$false] %s480_s22 }
  0x5f   : > { %414 = vtanh.f32 %v207_v7  ;;  %p478_p6 = pnand %p477_p13, %p680_p10  ;;  %s482_s27 = scalar_lea.vmem %s481_s22, 256 }
  0x60   : > { %416 = vtanh.f32 %v209_v8  ;;  %p483_p12 = scmp.lt.s32.totalorder %s746_s19, %s481_s22  ;;  %p484_p11 = scmp.lt.s32.totalorder %s482_s27, %s476_s24 }
  0x61   : > { %p479_p8 = pneg %p478_p6 }
  0x62   : > { %p485_p0 = por %p484_p11, %p483_p12 }
  0x64   : > { %p486_p5 = pnand %p485_p0, %p479_p8 }
  0x69   : > { %v415_v9 = vpop.eup %414 }
  0x6a   : > { %v417_v10 = vpop.eup %416  ;;  %v212_v11 = vadd.f32 1.0, %v415_v9 }
  0x6b   : > { %v214_v12 = vadd.f32 1.0, %v417_v10 }
  0x6c   : > { %v213_v13 = vmul.f32 0.25, %v212_v11 }
  0x6e   : > { %v215_v14 = vmul.f32 %v214_v12, %v213_v13 }
  0x70   : > { %216 = vst [vmem:[%s197_s17] sm:$0xff] %v215_v14 }
  0x71   : > { %489 = shalt.err (!%p486_p5)
}
  0x72   : > { %s490_s23 = scalar_lea.hbm %s751_s6, 128  ;;  %s494_s3 = scalar_lea.hbm %s800_s2, 256 }
  0x73   : > { %p491_p9 = scmp.ne.s32.totalorder %s751_s6, %s490_s23  ;;  %p495_p7 = scmp.lt.u32.totalorder %s751_s6, %s800_s2 }
  0x74   : > { %p496_p3 = scmp.lt.u32.totalorder %s494_s3, %s490_s23  ;;  %p498_p13 = scmp.lt.u32.totalorder %s490_s23, %s751_s6 }
  0x75   : > { %p492_p1 = pnand %p491_p9, %p680_p10 }
  0x76   : > { %p497_p4 = por %p496_p3, %p495_p7 }
  0x77   : > { %p493_p2 = pneg %p492_p1 }
  0x78   : > { %p499_p6 = por %p498_p13, %p497_p4 }
  0x7a   : > { %p500_p8 = pnand %p499_p6, %p493_p2 }
  0x7c   : > { %503 = shalt.err (!%p500_p8)
}
  0x7d   : > { %345 = dma.vmem_to_hbm [thread:$0]  (%p680_p10), %s746_s19, 128, %s751_s6, %s218_s7  }
  0x7e PF: > { %s244_s15 = sand.u32 1, %s542_s9   ;;  %p818_p12 = scmp.ne.s32.totalorder %s808_s20, 0 }
  0x7f   : > { %p819_p11 = scmp.ge.s32.totalorder %s562_s14, 2  ;;  %s245_s16 = scalar_lea.sflag [#allocation4], %s244_s15 }
  0x81   : > { %p356_p0 = pnand %p819_p11, %p818_p12 }
  0x83   : > { %537 = dma.done.wait (!%p356_p0), %s245_s16, 128  }
  0x84   : > { %539 = vsyncadd (!%p356_p0), %s245_s16, 4294967168  ;;  %s19_s14 = sadd.s32 1, %s562_s14   ;;  %s820_s9 = smov %s546_s10 }
  0x85   : > { %p16_p5 = scmp.ge.s32.totalorder %s19_s14, 4   ;;  %s821_s10 = smov %s550_s11 }
  0x86   : > { %s822_s11 = smov %s689_s28  ;;  %s823_s12 = smov %s558_s13 }
  0x87   : > { %s824_s13 = smov %s826_s25  ;;  %18 = sbr.rel (!%p16_p5) target bundleno = 7 (0x7), region = 81 }
  0x8e   :  { %250 = vsyncpa [#allocation3], 1 }
  0x8f   :  { %252 = vsyncpa [#allocation3 + $0x1], 1 }
  0x90   :  { %253 = vsyncpa [#allocation6], 1 }
  0x91   :  { %254 = vsyncpa [#allocation4], 1 }
  0x92   :  { %256 = vsyncpa [#allocation4 + $0x1], 1 }

</bundles_post_ra>
